<compile_context>
chip_gen: v7x
topology: tpu7x:2x2x1
jax: 0.10.0
libtpu: 0.0.40
codegen_flags: <defaults>
</compile_context>

<pallas_src>
import functools

import numpy as np
import jax
import jax.numpy as jnp
from jax.experimental import pallas as pl
from jax.experimental.pallas import tpu as pltpu

OUT_SLAB_WIDTH = 128  # lane-dense output slab


# --------------------------------------------------------------------------- #
# Kernel
# --------------------------------------------------------------------------- #
def _ppo_dop_kernel(action_dim,
                    x_ref, convw_ref, convb_ref,
                    cw1_ref, cb1_ref, cw2_ref, cb2_ref,
                    tw_ref, tb_ref,
                    hw1_ref, hb1_ref, mvw_ref, mvb_ref,
                    r2_ref, selmask_ref, eps_ref,
                    out_ref):
    A = action_dim
    cd = convw_ref.dtype  # MXU compute dtype (f32 or bf16); accum is always f32

    # features: Conv1d (Toeplitz matmul) + ReLU + Flatten
    x = x_ref[...]
    feat = jnp.dot(x, convw_ref[...], preferred_element_type=jnp.float32)
    feat = jnp.maximum(feat + convb_ref[...], 0.0)                   # (TB, fc) f32
    featc = feat.astype(cd)

    # critic: Linear -> ReLU -> Linear
    h = jnp.dot(featc, cw1_ref[...], preferred_element_type=jnp.float32) + cb1_ref[...]
    h = jnp.maximum(h, 0.0)
    value = jnp.dot(h.astype(cd), cw2_ref[...],
                    preferred_element_type=jnp.float32) + cb2_ref[...]   # (TB, 1)

    # actor trunk: Linear -> ReLU
    t = jnp.dot(featc, tw_ref[...], preferred_element_type=jnp.float32) + tb_ref[...]
    t = jnp.maximum(t, 0.0)                                          # (TB, fc)

    # fused ActorNHeads stage 1: all H head hidden layers in one matmul
    hh = jnp.dot(t.astype(cd), hw1_ref[...],
                 preferred_element_type=jnp.float32) + hb1_ref[...]  # (TB, H*ah1)
    hh = jnp.maximum(hh, 0.0)

    # fused ActorNHeads stage 2: block-diagonal mu|var projection for all heads
    mv = jnp.dot(hh.astype(cd), mvw_ref[...],
                 preferred_element_type=jnp.float32) + mvb_ref[...]  # (TB, 2*H*A)

    # head selection (torch gather(argmax)) as one-hot masked reduce-matmul,
    # applied BEFORE the nonlinearities (gather commutes with elementwise ops)
    mv_sel = jnp.dot(selmask_ref[...] * mv, r2_ref[...],
                     preferred_element_type=jnp.float32)             # (TB, 2A) f32

    # nonlinear epilogue on the selected head only (f32 on VPU/EUP)
    mu = jnp.tanh(mv_sel[:, :A])
    var = jax.nn.softplus(mv_sel[:, A:])
    std = jnp.maximum(jnp.sqrt(var), 1e-3)       # Normal(mu, var.sqrt().clamp(1e-3))
    action = mu + std * eps_ref[...]             # reparameterized .sample()

    # single lane-dense output slab: [value | action | mu | var | 0-pad]
    out_ref[...] = jnp.zeros_like(out_ref)
    out_ref[:, 0:1] = value
    out_ref[:, 1:1 + A] = action
    out_ref[:, 1 + A:1 + 2 * A] = mu
    out_ref[:, 1 + 2 * A:1 + 3 * A] = var


# --------------------------------------------------------------------------- #
# Host-side parameter packing (done once)
# --------------------------------------------------------------------------- #
def conv1d_as_dense(conv_w, conv_b, C, W, K, stride, pad):
    """(C*W, F*L) Toeplitz matrix + (1, F*L) bias for Conv1d+Flatten (col order f*L+l)."""
    F = conv_w.shape[0]
    L = (W + 2 * pad - K) // stride + 1
    Wd = np.zeros((C * W, F * L), np.float32)
    bd = np.zeros((1, F * L), np.float32)
    for f in range(F):
        for l in range(L):
            col = f * L + l                      # matches nn.Flatten on (B, F, L)
            bd[0, col] = conv_b[f]
            for c in range(C):
                for k in range(K):
                    wi = stride * l - pad + k
                    if 0 <= wi < W:
                        Wd[c * W + wi, col] = conv_w[f, c, k]
    return Wd, bd


def fuse_actor_heads(heads_w1, heads_b1, mu_w, mu_b, var_w, var_b):
    """Stack per-head Linear weights and build the block-diagonal mu|var matrix."""
    H, fc, ah1 = heads_w1.shape
    A = mu_w.shape[-1]
    wh1 = np.transpose(heads_w1, (1, 0, 2)).reshape(fc, H * ah1).astype(np.float32)
    bh1 = heads_b1.reshape(1, H * ah1).astype(np.float32)
    wmv = np.zeros((H * ah1, 2 * H * A), np.float32)
    bmv = np.zeros((1, 2 * H * A), np.float32)
    for hi in range(H):
        wmv[hi * ah1:(hi + 1) * ah1, hi * A:(hi + 1) * A] = mu_w[hi]
        wmv[hi * ah1:(hi + 1) * ah1, H * A + hi * A:H * A + (hi + 1) * A] = var_w[hi]
        bmv[0, hi * A:(hi + 1) * A] = mu_b[hi].reshape(-1)
        bmv[0, H * A + hi * A:H * A + (hi + 1) * A] = var_b[hi].reshape(-1)
    return wh1, bh1, wmv, bmv


def head_select_matrix(H, A):
    """(2*H*A, 2*A) reducer: sums masked per-head (mu|var) columns into (mu|var)."""
    r2 = np.zeros((2 * H * A, 2 * A), np.float32)
    for hi in range(H):
        for a in range(A):
            r2[hi * A + a, a] = 1.0
            r2[H * A + hi * A + a, A + a] = 1.0
    return r2


def prepare_kernel_params(conv_w, conv_b, raw, C, W, K, stride, pad, *,
                          head_count, action_dim):
    conv_wd, conv_bd = conv1d_as_dense(np.asarray(conv_w), np.asarray(conv_b),
                                       C, W, K, stride, pad)
    wh1, bh1, wmv, bmv = fuse_actor_heads(
        np.asarray(raw['heads_w1']), np.asarray(raw['heads_b1']),
        np.asarray(raw['mu_w']), np.asarray(raw['mu_b']),
        np.asarray(raw['var_w']), np.asarray(raw['var_b']))
    r2 = head_select_matrix(head_count, action_dim)
    return dict(
        conv_wd=jnp.asarray(conv_wd), conv_bd=jnp.asarray(conv_bd),
        critic_w1=raw['critic_w1'], critic_b1=raw['critic_b1'],
        critic_w2=raw['critic_w2'], critic_b2=raw['critic_b2'],
        trunk_w=raw['trunk_w'], trunk_b=raw['trunk_b'],
        heads_w1f=jnp.asarray(wh1), heads_b1f=jnp.asarray(bh1),
        mv_w=jnp.asarray(wmv), mv_b=jnp.asarray(bmv),
        head_select=jnp.asarray(r2),
    )


# --------------------------------------------------------------------------- #
# Wrapper
# --------------------------------------------------------------------------- #
def ppo_aeris_dop_ref_forward(state, params, eps, argmax, *, head_count, action_dim,
                              compute_dtype=jnp.float32):
    """state: (B, C, W) f32; eps: (H, B, A) f32; argmax: (B,) int.
    Returns (value (B,1), action (B,A), probs (B,2A))."""
    B = state.shape[0]
    A = action_dim
    H = head_count

    x_flat = state.reshape(B, -1).astype(compute_dtype)               # (B, C*W)

    # one-hot head mask, duplicated over the mu|var halves -> (B, 2*H*A)
    sel = jax.nn.one_hot(argmax, H, dtype=jnp.float32)
    rep = jnp.repeat(sel, A, axis=1)                                  # (B, H*A)
    selmask = jnp.concatenate([rep, rep], axis=1)                     # (B, 2*H*A)
    # noise of the selected head only (lane-dense, single load in-kernel)
    eps_sel = eps[argmax, jnp.arange(B)]                              # (B, A)

    # batch tiling: one tile if small, else 256-row tiles ("parallel" grid axis)
    MAX_TB = 256
    if B <= MAX_TB:
        TB, Bp = B, B
    else:
        TB = MAX_TB
        Bp = ((B + TB - 1) // TB) * TB
    if Bp != B:
        padrows = Bp - B
        x_flat = jnp.pad(x_flat, ((0, padrows), (0, 0)))
        selmask = jnp.pad(selmask, ((0, padrows), (0, 0)))
        eps_sel = jnp.pad(eps_sel, ((0, padrows), (0, 0)))

    cast = lambda w: w.astype(compute_dtype)
    convw, convb = cast(params['conv_wd']), params['conv_bd']
    cw1, cb1 = cast(params['critic_w1']), params['critic_b1']
    cw2, cb2 = cast(params['critic_w2']), params['critic_b2']
    tw, tb = cast(params['trunk_w']), params['trunk_b']
    wh1, bh1 = cast(params['heads_w1f']), params['heads_b1f']
    wmv, bmv = cast(params['mv_w']), params['mv_b']
    r2 = params['head_select']

    assert 1 + 3 * A <= OUT_SLAB_WIDTH

    operands = (x_flat, convw, convb, cw1, cb1, cw2, cb2, tw, tb,
                wh1, bh1, wmv, bmv, r2, selmask, eps_sel)

    # advisory cost estimate (kernel is launch/DMA-overhead bound at small B)
    CW, fc = convw.shape
    ch1 = cw1.shape[1]
    flops = 2 * Bp * (CW * fc + fc * ch1 + ch1 + fc * fc
                      + fc * wh1.shape[1] + wh1.shape[1] * wmv.shape[1]
                      + wmv.shape[1] * 2 * A)
    bytes_accessed = int(sum(int(np.prod(a.shape)) * a.dtype.itemsize for a in operands)
                         + Bp * OUT_SLAB_WIDTH * 4)
    cost = pl.CostEstimate(flops=int(flops), transcendentals=int(3 * Bp * A),
                           bytes_accessed=bytes_accessed)

    def const_spec(arr):   # weights: same block every grid step -> VMEM resident
        return pl.BlockSpec(arr.shape, lambda i: (0,) * arr.ndim)

    def batch_spec(arr):   # per-batch-tile inputs
        return pl.BlockSpec((TB,) + arr.shape[1:], lambda i: (i,) + (0,) * (arr.ndim - 1))

    in_specs = [batch_spec(x_flat),
                const_spec(convw), const_spec(convb),
                const_spec(cw1), const_spec(cb1),
                const_spec(cw2), const_spec(cb2),
                const_spec(tw), const_spec(tb),
                const_spec(wh1), const_spec(bh1),
                const_spec(wmv), const_spec(bmv),
                const_spec(r2),
                batch_spec(selmask), batch_spec(eps_sel)]

    kernel = functools.partial(_ppo_dop_kernel, A)
    out = pl.pallas_call(
        kernel,
        out_shape=jax.ShapeDtypeStruct((Bp, OUT_SLAB_WIDTH), jnp.float32),
        grid=(Bp // TB,),
        in_specs=in_specs,
        out_specs=pl.BlockSpec((TB, OUT_SLAB_WIDTH), lambda i: (i, 0)),
        compiler_params=pltpu.CompilerParams(dimension_semantics=("parallel",)),
        cost_estimate=cost,
    )(*operands)

    out = out[:B]
    value = out[:, 0:1]
    action = out[:, 1:1 + A]
    probs = out[:, 1 + A:1 + 3 * A]
    return value, action, probs


# --------------------------------------------------------------------------- #
# Plain-JAX reference (per-head loop, lax conv) for correctness cross-check
# --------------------------------------------------------------------------- #
def _jnp_reference(state, conv_w, conv_b, params, eps, sel):
    B = state.shape[0]
    conv = jax.lax.conv_general_dilated(
        state, conv_w, window_strides=(4,), padding=[(2, 2)],
        dimension_numbers=('NCH', 'OIH', 'NCH'))
    conv = jnp.maximum(conv + conv_b[None, :, None], 0.0)
    feat = conv.reshape(B, -1)
    h = jnp.maximum(feat @ params['critic_w1'] + params['critic_b1'], 0.0)
    value = h @ params['critic_w2'] + params['critic_b2']
    t = jnp.maximum(feat @ params['trunk_w'] + params['trunk_b'], 0.0)
    acts, mus, vrs = [], [], []
    for hi in range(sel.shape[1]):
        hh = jnp.maximum(t @ params['heads_w1'][hi] + params['heads_b1'][hi], 0.0)
        mu = jnp.tanh(hh @ params['mu_w'][hi] + params['mu_b'][hi])
        var = jax.nn.softplus(hh @ params['var_w'][hi] + params['var_b'][hi])
        std = jnp.maximum(jnp.sqrt(var), 1e-3)
        acts.append(mu + std * eps[hi]); mus.append(mu); vrs.append(var)
    act = jnp.stack(acts, 1); mu_s = jnp.stack(mus, 1); var_s = jnp.stack(vrs, 1)
    action = jnp.einsum('bh,bha->ba', sel, act)
    probs = jnp.concatenate([jnp.einsum('bh,bha->ba', sel, mu_s),
                             jnp.einsum('bh,bha->ba', sel, var_s)], axis=1)
    return value, action, probs


if __name__ == "__main__":
    # small config consistent with the module
    B, C, W = 2, 4, 16                 # batch, input_shape = (channels, width)
    F = 8                              # config.critic_kernels_count
    critic_h1 = 32                     # config.critic_h1
    actor_h1 = 32                      # config.actor_h1
    A = 4                              # action_dim
    H = 4                              # head_count (fixed in module)
    K, stride, pad = 8, 4, 2
    L = (W + 2 * pad - K) // stride + 1
    fc = F * L                         # = critic_kernels_count * width // 4

    key = jax.random.PRNGKey(0)
    ks = jax.random.split(key, 20)

    def init(k, shape, scale=0.1):
        return scale * jax.random.normal(k, shape, dtype=jnp.float32)

    # deterministic synthetic parameters (orthogonal/xavier init replaced by
    # deterministic gaussians of the right shapes)
    conv_w = init(ks[0], (F, C, K))
    conv_b = init(ks[1], (F,))

    raw = dict(
        critic_w1=init(ks[2], (fc, critic_h1)),
        critic_b1=init(ks[3], (1, critic_h1)),
        critic_w2=init(ks[4], (critic_h1, 1)),
        critic_b2=init(ks[5], (1, 1)),
        trunk_w=init(ks[6], (fc, fc)),
        trunk_b=jnp.zeros((1, fc), jnp.float32),          # nn.init.zeros_
        heads_w1=init(ks[7], (H, fc, actor_h1)),
        heads_b1=init(ks[8], (H, 1, actor_h1)),
        mu_w=init(ks[9], (H, actor_h1, A)),
        mu_b=init(ks[10], (H, 1, A)),
        var_w=init(ks[11], (H, actor_h1, A)),
        var_b=init(ks[12], (H, 1, A)),
    )
    params = prepare_kernel_params(conv_w, conv_b, raw, C, W, K, stride, pad,
                                   head_count=H, action_dim=A)

    state = jax.random.normal(ks[13], (B, C, W), dtype=jnp.float32)
    eps = jax.random.normal(ks[14], (H, B, A), dtype=jnp.float32)   # Normal .sample() noise
    argmax = jax.random.randint(ks[15], (B,), 0, H)                 # torch.randint(0, head_count)
    sel = jax.nn.one_hot(argmax, H, dtype=jnp.float32)

    # f32 kernel path
    value, action, probs = ppo_aeris_dop_ref_forward(
        state, params, eps, argmax, head_count=H, action_dim=A)
    jax.block_until_ready((value, action, probs))

    v_ref, a_ref, p_ref = _jnp_reference(state, conv_w, conv_b, raw, eps, sel)
    assert value.shape == (B, 1) and action.shape == (B, A) and probs.shape == (B, 2 * A)
    np.testing.assert_allclose(np.array(value), np.array(v_ref), atol=1e-4, rtol=1e-4)
    np.testing.assert_allclose(np.array(action), np.array(a_ref), atol=1e-4, rtol=1e-4)
    np.testing.assert_allclose(np.array(probs), np.array(p_ref), atol=1e-4, rtol=1e-4)

    # bf16 MXU path (v6e/v7x): bf16 operands, f32 accumulation, f32 epilogue
    v16, a16, p16 = ppo_aeris_dop_ref_forward(
        state, params, eps, argmax, head_count=H, action_dim=A,
        compute_dtype=jnp.bfloat16)
    jax.block_until_ready((v16, a16, p16))
    np.testing.assert_allclose(np.array(v16), np.array(v_ref), atol=5e-2, rtol=5e-2)
    np.testing.assert_allclose(np.array(a16), np.array(a_ref), atol=5e-2, rtol=5e-2)
    np.testing.assert_allclose(np.array(p16), np.array(p_ref), atol=5e-2, rtol=5e-2)

    print("KERNEL_OK")
</pallas_src>

<mosaic_0001>
module attributes {stable_mosaic.version = 11 : i64} {
  func.func @_ppo_dop_kernel(%arg0: i32, %arg1: memref<2x64xf32, #tpu.memory_space<vmem>>, %arg2: memref<64x32xf32, #tpu.memory_space<vmem>>, %arg3: memref<1x32xf32, #tpu.memory_space<vmem>>, %arg4: memref<32x32xf32, #tpu.memory_space<vmem>>, %arg5: memref<1x32xf32, #tpu.memory_space<vmem>>, %arg6: memref<32x1xf32, #tpu.memory_space<vmem>>, %arg7: memref<1x1xf32, #tpu.memory_space<vmem>>, %arg8: memref<32x32xf32, #tpu.memory_space<vmem>>, %arg9: memref<1x32xf32, #tpu.memory_space<vmem>>, %arg10: memref<32x128xf32, #tpu.memory_space<vmem>>, %arg11: memref<1x128xf32, #tpu.memory_space<vmem>>, %arg12: memref<128x32xf32, #tpu.memory_space<vmem>>, %arg13: memref<1x32xf32, #tpu.memory_space<vmem>>, %arg14: memref<32x8xf32, #tpu.memory_space<vmem>>, %arg15: memref<2x32xf32, #tpu.memory_space<vmem>>, %arg16: memref<2x4xf32, #tpu.memory_space<vmem>>, %arg17: memref<2x128xf32, #tpu.memory_space<vmem>>) attributes {dimension_semantics = [#tpu.dimension_semantics<parallel>], iteration_bounds = array<i64: 1>, scalar_prefetch = 0 : i64, scratch_operands = 0 : i64, tpu.core_type = #tpu.core_type<tc>, window_params = [{transform_indices = @transform_0, window_bounds = array<i64: 2, 64>}, {pipeline_mode = #tpu.pipeline_mode<synchronous>, transform_indices = @transform_1, window_bounds = array<i64: 64, 32>}, {pipeline_mode = #tpu.pipeline_mode<synchronous>, transform_indices = @transform_2, window_bounds = array<i64: 1, 32>}, {pipeline_mode = #tpu.pipeline_mode<synchronous>, transform_indices = @transform_3, window_bounds = array<i64: 32, 32>}, {pipeline_mode = #tpu.pipeline_mode<synchronous>, transform_indices = @transform_4, window_bounds = array<i64: 1, 32>}, {pipeline_mode = #tpu.pipeline_mode<synchronous>, transform_indices = @transform_5, window_bounds = array<i64: 32, 1>}, {pipeline_mode = #tpu.pipeline_mode<synchronous>, transform_indices = @transform_6, window_bounds = array<i64: 1, 1>}, {pipeline_mode = #tpu.pipeline_mode<synchronous>, transform_indices = @transform_7, window_bounds = array<i64: 32, 32>}, {pipeline_mode = #tpu.pipeline_mode<synchronous>, transform_indices = @transform_8, window_bounds = array<i64: 1, 32>}, {pipeline_mode = #tpu.pipeline_mode<synchronous>, transform_indices = @transform_9, window_bounds = array<i64: 32, 128>}, {pipeline_mode = #tpu.pipeline_mode<synchronous>, transform_indices = @transform_10, window_bounds = array<i64: 1, 128>}, {pipeline_mode = #tpu.pipeline_mode<synchronous>, transform_indices = @transform_11, window_bounds = array<i64: 128, 32>}, {pipeline_mode = #tpu.pipeline_mode<synchronous>, transform_indices = @transform_12, window_bounds = array<i64: 1, 32>}, {pipeline_mode = #tpu.pipeline_mode<synchronous>, transform_indices = @transform_13, window_bounds = array<i64: 32, 8>}, {transform_indices = @transform_14, window_bounds = array<i64: 2, 32>}, {transform_indices = @transform_15, window_bounds = array<i64: 2, 4>}, {transform_indices = @transform_16, window_bounds = array<i64: 2, 128>}]} {
    %c0 = arith.constant 0 : index
    %c0_0 = arith.constant 0 : index
    %0 = vector.load %arg1[%c0, %c0_0] : memref<2x64xf32, #tpu.memory_space<vmem>>, vector<2x64xf32>
    %c0_1 = arith.constant 0 : index
    %c0_2 = arith.constant 0 : index
    %1 = vector.load %arg2[%c0_1, %c0_2] : memref<64x32xf32, #tpu.memory_space<vmem>>, vector<64x32xf32>
    %cst = arith.constant dense<0.000000e+00> : vector<2x32xf32>
    %2 = tpu.matmul %0, %1, %cst {dimension_numbers = #tpu.dot_dimension_numbers<[1], [0], [0], [1], [0, 0, 1, 1], [], []>} : vector<2x64xf32>, vector<64x32xf32>, vector<2x32xf32> -> vector<2x32xf32>
    %c0_3 = arith.constant 0 : index
    %c0_4 = arith.constant 0 : index
    %3 = vector.load %arg3[%c0_3, %c0_4] : memref<1x32xf32, #tpu.memory_space<vmem>>, vector<1x32xf32>
    %4 = vector.broadcast %3 : vector<1x32xf32> to vector<2x32xf32>
    %5 = arith.addf %2, %4 : vector<2x32xf32>
    %cst_5 = arith.constant 0.000000e+00 : f32
    %6 = vector.broadcast %cst_5 : f32 to vector<2x32xf32>
    %7 = arith.maximumf %5, %6 : vector<2x32xf32>
    %c0_6 = arith.constant 0 : index
    %c0_7 = arith.constant 0 : index
    %8 = vector.load %arg4[%c0_6, %c0_7] : memref<32x32xf32, #tpu.memory_space<vmem>>, vector<32x32xf32>
    %cst_8 = arith.constant dense<0.000000e+00> : vector<2x32xf32>
    %9 = tpu.matmul %7, %8, %cst_8 {dimension_numbers = #tpu.dot_dimension_numbers<[1], [0], [0], [1], [0, 0, 1, 1], [], []>} : vector<2x32xf32>, vector<32x32xf32>, vector<2x32xf32> -> vector<2x32xf32>
    %c0_9 = arith.constant 0 : index
    %c0_10 = arith.constant 0 : index
    %10 = vector.load %arg5[%c0_9, %c0_10] : memref<1x32xf32, #tpu.memory_space<vmem>>, vector<1x32xf32>
    %11 = vector.broadcast %10 : vector<1x32xf32> to vector<2x32xf32>
    %12 = arith.addf %9, %11 : vector<2x32xf32>
    %cst_11 = arith.constant 0.000000e+00 : f32
    %13 = vector.broadcast %cst_11 : f32 to vector<2x32xf32>
    %14 = arith.maximumf %12, %13 : vector<2x32xf32>
    %c0_12 = arith.constant 0 : index
    %c0_13 = arith.constant 0 : index
    %15 = vector.load %arg6[%c0_12, %c0_13] : memref<32x1xf32, #tpu.memory_space<vmem>>, vector<32x1xf32>
    %cst_14 = arith.constant dense<0.000000e+00> : vector<2x1xf32>
    %16 = tpu.matmul %14, %15, %cst_14 {dimension_numbers = #tpu.dot_dimension_numbers<[1], [0], [0], [1], [0, 0, 1, 1], [], []>} : vector<2x32xf32>, vector<32x1xf32>, vector<2x1xf32> -> vector<2x1xf32>
    %c0_15 = arith.constant 0 : index
    %c0_16 = arith.constant 0 : index
    %17 = vector.load %arg7[%c0_15, %c0_16] : memref<1x1xf32, #tpu.memory_space<vmem>>, vector<1x1xf32>
    %18 = vector.broadcast %17 : vector<1x1xf32> to vector<2x1xf32>
    %19 = arith.addf %16, %18 : vector<2x1xf32>
    %c0_17 = arith.constant 0 : index
    %c0_18 = arith.constant 0 : index
    %20 = vector.load %arg8[%c0_17, %c0_18] : memref<32x32xf32, #tpu.memory_space<vmem>>, vector<32x32xf32>
    %cst_19 = arith.constant dense<0.000000e+00> : vector<2x32xf32>
    %21 = tpu.matmul %7, %20, %cst_19 {dimension_numbers = #tpu.dot_dimension_numbers<[1], [0], [0], [1], [0, 0, 1, 1], [], []>} : vector<2x32xf32>, vector<32x32xf32>, vector<2x32xf32> -> vector<2x32xf32>
    %c0_20 = arith.constant 0 : index
    %c0_21 = arith.constant 0 : index
    %22 = vector.load %arg9[%c0_20, %c0_21] : memref<1x32xf32, #tpu.memory_space<vmem>>, vector<1x32xf32>
    %23 = vector.broadcast %22 : vector<1x32xf32> to vector<2x32xf32>
    %24 = arith.addf %21, %23 : vector<2x32xf32>
    %cst_22 = arith.constant 0.000000e+00 : f32
    %25 = vector.broadcast %cst_22 : f32 to vector<2x32xf32>
    %26 = arith.maximumf %24, %25 : vector<2x32xf32>
    %c0_23 = arith.constant 0 : index
    %c0_24 = arith.constant 0 : index
    %27 = vector.load %arg10[%c0_23, %c0_24] : memref<32x128xf32, #tpu.memory_space<vmem>>, vector<32x128xf32>
    %cst_25 = arith.constant dense<0.000000e+00> : vector<2x128xf32>
    %28 = tpu.matmul %26, %27, %cst_25 {dimension_numbers = #tpu.dot_dimension_numbers<[1], [0], [0], [1], [0, 0, 1, 1], [], []>} : vector<2x32xf32>, vector<32x128xf32>, vector<2x128xf32> -> vector<2x128xf32>
    %c0_26 = arith.constant 0 : index
    %c0_27 = arith.constant 0 : index
    %29 = vector.load %arg11[%c0_26, %c0_27] : memref<1x128xf32, #tpu.memory_space<vmem>>, vector<1x128xf32>
    %30 = vector.broadcast %29 : vector<1x128xf32> to vector<2x128xf32>
    %31 = arith.addf %28, %30 : vector<2x128xf32>
    %cst_28 = arith.constant 0.000000e+00 : f32
    %32 = vector.broadcast %cst_28 : f32 to vector<2x128xf32>
    %33 = arith.maximumf %31, %32 : vector<2x128xf32>
    %c0_29 = arith.constant 0 : index
    %c0_30 = arith.constant 0 : index
    %34 = vector.load %arg12[%c0_29, %c0_30] : memref<128x32xf32, #tpu.memory_space<vmem>>, vector<128x32xf32>
    %cst_31 = arith.constant dense<0.000000e+00> : vector<2x32xf32>
    %35 = tpu.matmul %33, %34, %cst_31 {dimension_numbers = #tpu.dot_dimension_numbers<[1], [0], [0], [1], [0, 0, 1, 1], [], []>} : vector<2x128xf32>, vector<128x32xf32>, vector<2x32xf32> -> vector<2x32xf32>
    %c0_32 = arith.constant 0 : index
    %c0_33 = arith.constant 0 : index
    %36 = vector.load %arg13[%c0_32, %c0_33] : memref<1x32xf32, #tpu.memory_space<vmem>>, vector<1x32xf32>
    %37 = vector.broadcast %36 : vector<1x32xf32> to vector<2x32xf32>
    %38 = arith.addf %35, %37 : vector<2x32xf32>
    %c0_34 = arith.constant 0 : index
    %c0_35 = arith.constant 0 : index
    %39 = vector.load %arg15[%c0_34, %c0_35] : memref<2x32xf32, #tpu.memory_space<vmem>>, vector<2x32xf32>
    %40 = arith.mulf %39, %38 : vector<2x32xf32>
    %c0_36 = arith.constant 0 : index
    %c0_37 = arith.constant 0 : index
    %41 = vector.load %arg14[%c0_36, %c0_37] : memref<32x8xf32, #tpu.memory_space<vmem>>, vector<32x8xf32>
    %cst_38 = arith.constant dense<0.000000e+00> : vector<2x8xf32>
    %42 = tpu.matmul %40, %41, %cst_38 {dimension_numbers = #tpu.dot_dimension_numbers<[1], [0], [0], [1], [0, 0, 1, 1], [], []>} : vector<2x32xf32>, vector<32x8xf32>, vector<2x8xf32> -> vector<2x8xf32>
    %43 = vector.extract_strided_slice %42 {offsets = [0, 0], sizes = [2, 4], strides = [1, 1]} : vector<2x8xf32> to vector<2x4xf32>
    %44 = math.tanh %43 : vector<2x4xf32>
    %45 = vector.extract_strided_slice %42 {offsets = [0, 4], sizes = [2, 4], strides = [1, 1]} : vector<2x8xf32> to vector<2x4xf32>
    %cst_39 = arith.constant 0.000000e+00 : f32
    %46 = vector.broadcast %cst_39 : f32 to vector<2x4xf32>
    %47 = arith.maximumf %45, %46 : vector<2x4xf32>
    %48 = vector.broadcast %cst_39 : f32 to vector<2x4xf32>
    %49 = arith.subf %45, %48 : vector<2x4xf32>
    %50 = arith.cmpf one, %49, %49 : vector<2x4xf32>
    %51 = vector.broadcast %cst_39 : f32 to vector<2x4xf32>
    %52 = arith.addf %45, %51 : vector<2x4xf32>
    %53 = math.absf %49 : vector<2x4xf32>
    %cst_40 = arith.constant 0.000000e+00 : f32
    %54 = vector.broadcast %cst_40 : f32 to vector<2x4xf32>
    %55 = arith.subf %54, %53 : vector<2x4xf32>
    %56 = math.exp %55 : vector<2x4xf32>
    %57 = math.log1p %56 : vector<2x4xf32>
    %58 = arith.addf %47, %57 : vector<2x4xf32>
    %59 = arith.select %50, %52, %58 : vector<2x4xi1>, vector<2x4xf32>
    %60 = math.sqrt %59 : vector<2x4xf32>
    %cst_41 = arith.constant 1.000000e-03 : f32
    %61 = vector.broadcast %cst_41 : f32 to vector<2x4xf32>
    %62 = arith.maximumf %60, %61 : vector<2x4xf32>
    %c0_42 = arith.constant 0 : index
    %c0_43 = arith.constant 0 : index
    %63 = vector.load %arg16[%c0_42, %c0_43] : memref<2x4xf32, #tpu.memory_space<vmem>>, vector<2x4xf32>
    %64 = arith.mulf %62, %63 : vector<2x4xf32>
    %65 = arith.addf %44, %64 : vector<2x4xf32>
    %cst_44 = arith.constant 0.000000e+00 : f32
    %66 = vector.broadcast %cst_44 : f32 to vector<2x128xf32>
    %c0_45 = arith.constant 0 : index
    %c0_46 = arith.constant 0 : index
    %67 = vector.load %arg17[%c0_45, %c0_46] : memref<2x128xf32, #tpu.memory_space<vmem>>, vector<2x128xf32>
    tpu.vector_store %arg17[%c0_45, %c0_46], %66 {strides = array<i32>} : memref<2x128xf32, #tpu.memory_space<vmem>>, vector<2x128xf32>,
    %c0_47 = arith.constant 0 : index
    %c0_48 = arith.constant 0 : index
    %68 = vector.load %arg17[%c0_47, %c0_48] : memref<2x128xf32, #tpu.memory_space<vmem>>, vector<2x1xf32>
    tpu.vector_store %arg17[%c0_47, %c0_48], %19 {strides = array<i32>} : memref<2x128xf32, #tpu.memory_space<vmem>>, vector<2x1xf32>,
    %c0_49 = arith.constant 0 : index
    %c1 = arith.constant 1 : index
    %69 = vector.load %arg17[%c0_49, %c1] : memref<2x128xf32, #tpu.memory_space<vmem>>, vector<2x4xf32>
    tpu.vector_store %arg17[%c0_49, %c1], %65 {strides = array<i32>} : memref<2x128xf32, #tpu.memory_space<vmem>>, vector<2x4xf32>,
    %c0_50 = arith.constant 0 : index
    %c5 = arith.constant 5 : index
    %70 = vector.load %arg17[%c0_50, %c5] : memref<2x128xf32, #tpu.memory_space<vmem>>, vector<2x4xf32>
    tpu.vector_store %arg17[%c0_50, %c5], %44 {strides = array<i32>} : memref<2x128xf32, #tpu.memory_space<vmem>>, vector<2x4xf32>,
    %c0_51 = arith.constant 0 : index
    %c9 = arith.constant 9 : index
    %71 = vector.load %arg17[%c0_51, %c9] : memref<2x128xf32, #tpu.memory_space<vmem>>, vector<2x4xf32>
    tpu.vector_store %arg17[%c0_51, %c9], %59 {strides = array<i32>} : memref<2x128xf32, #tpu.memory_space<vmem>>, vector<2x4xf32>,
    return
  }
  func.func @transform_0(%arg0: i32) -> (i32, i32) {
    %c0_i32 = arith.constant 0 : i32
    %c0_i32_0 = arith.constant 0 : i32
    return %arg0, %c0_i32 : i32, i32
  }
  func.func @transform_1(%arg0: i32) -> (i32, i32) {
    %c0_i32 = arith.constant 0 : i32
    %c0_i32_0 = arith.constant 0 : i32
    %c0_i32_1 = arith.constant 0 : i32
    return %c0_i32, %c0_i32_0 : i32, i32
  }
  func.func @transform_2(%arg0: i32) -> (i32, i32) {
    %c0_i32 = arith.constant 0 : i32
    %c0_i32_0 = arith.constant 0 : i32
    %c0_i32_1 = arith.constant 0 : i32
    return %c0_i32, %c0_i32_0 : i32, i32
  }
  func.func @transform_3(%arg0: i32) -> (i32, i32) {
    %c0_i32 = arith.constant 0 : i32
    %c0_i32_0 = arith.constant 0 : i32
    %c0_i32_1 = arith.constant 0 : i32
    return %c0_i32, %c0_i32_0 : i32, i32
  }
  func.func @transform_4(%arg0: i32) -> (i32, i32) {
    %c0_i32 = arith.constant 0 : i32
    %c0_i32_0 = arith.constant 0 : i32
    %c0_i32_1 = arith.constant 0 : i32
    return %c0_i32, %c0_i32_0 : i32, i32
  }
  func.func @transform_5(%arg0: i32) -> (i32, i32) {
    %c0_i32 = arith.constant 0 : i32
    %c0_i32_0 = arith.constant 0 : i32
    %c0_i32_1 = arith.constant 0 : i32
    return %c0_i32, %c0_i32_0 : i32, i32
  }
  func.func @transform_6(%arg0: i32) -> (i32, i32) {
    %c0_i32 = arith.constant 0 : i32
    %c0_i32_0 = arith.constant 0 : i32
    %c0_i32_1 = arith.constant 0 : i32
    return %c0_i32, %c0_i32_0 : i32, i32
  }
  func.func @transform_7(%arg0: i32) -> (i32, i32) {
    %c0_i32 = arith.constant 0 : i32
    %c0_i32_0 = arith.constant 0 : i32
    %c0_i32_1 = arith.constant 0 : i32
    return %c0_i32, %c0_i32_0 : i32, i32
  }
  func.func @transform_8(%arg0: i32) -> (i32, i32) {
    %c0_i32 = arith.constant 0 : i32
    %c0_i32_0 = arith.constant 0 : i32
    %c0_i32_1 = arith.constant 0 : i32
    return %c0_i32, %c0_i32_0 : i32, i32
  }
  func.func @transform_9(%arg0: i32) -> (i32, i32) {
    %c0_i32 = arith.constant 0 : i32
    %c0_i32_0 = arith.constant 0 : i32
    %c0_i32_1 = arith.constant 0 : i32
    return %c0_i32, %c0_i32_0 : i32, i32
  }
  func.func @transform_10(%arg0: i32) -> (i32, i32) {
    %c0_i32 = arith.constant 0 : i32
    %c0_i32_0 = arith.constant 0 : i32
    %c0_i32_1 = arith.constant 0 : i32
    return %c0_i32, %c0_i32_0 : i32, i32
  }
  func.func @transform_11(%arg0: i32) -> (i32, i32) {
    %c0_i32 = arith.constant 0 : i32
    %c0_i32_0 = arith.constant 0 : i32
    %c0_i32_1 = arith.constant 0 : i32
    return %c0_i32, %c0_i32_0 : i32, i32
  }
  func.func @transform_12(%arg0: i32) -> (i32, i32) {
    %c0_i32 = arith.constant 0 : i32
    %c0_i32_0 = arith.constant 0 : i32
    %c0_i32_1 = arith.constant 0 : i32
    return %c0_i32, %c0_i32_0 : i32, i32
  }
  func.func @transform_13(%arg0: i32) -> (i32, i32) {
    %c0_i32 = arith.constant 0 : i32
    %c0_i32_0 = arith.constant 0 : i32
    %c0_i32_1 = arith.constant 0 : i32
    return %c0_i32, %c0_i32_0 : i32, i32
  }
  func.func @transform_14(%arg0: i32) -> (i32, i32) {
    %c0_i32 = arith.constant 0 : i32
    %c0_i32_0 = arith.constant 0 : i32
    return %arg0, %c0_i32 : i32, i32
  }
  func.func @transform_15(%arg0: i32) -> (i32, i32) {
    %c0_i32 = arith.constant 0 : i32
    %c0_i32_0 = arith.constant 0 : i32
    return %arg0, %c0_i32 : i32, i32
  }
  func.func @transform_16(%arg0: i32) -> (i32, i32) {
    %c0_i32 = arith.constant 0 : i32
    %c0_i32_0 = arith.constant 0 : i32
    return %arg0, %c0_i32 : i32, i32
  }
}

</mosaic_0001>

<bundles_post_ra>
// kernel: tpu_custom_call.1
= control target key start
LH: loop header
LB: loop body
LE: loop exit
PB: predicated region body
PF: predicated region fallthrough
CT: control target
= control target key end

     0   :  { %s1313_s0 = inlined_call_operand.vmem [shape: f32[2,64], index: 0, kind: input, shape index: {}]   ;;  %s1314_s1 = inlined_call_operand.vmem [shape: f32[64,32], index: 1, kind: input, shape index: {}]   ;;  %s1315_s2 = inlined_call_operand.vmem [shape: f32[1,32], index: 2, kind: input, shape index: {}]   ;;  %s1316_s3 = inlined_call_operand.vmem [shape: f32[32,32], index: 3, kind: input, shape index: {}]   ;;  %s1317_s4 = inlined_call_operand.vmem [shape: f32[1,32], index: 4, kind: input, shape index: {}]   ;;  %s1318_s5 = inlined_call_operand.vmem [shape: f32[32,1], index: 5, kind: input, shape index: {}]   ;;  %s1319_s6 = inlined_call_operand.<no memory space> [shape: f32[1,1], index: 6, kind: input, shape index: {}]   ;;  %s1320_s7 = inlined_call_operand.vmem [shape: f32[32,32], index: 7, kind: input, shape index: {}]   ;;  %s1321_s8 = inlined_call_operand.vmem [shape: f32[1,32], index: 8, kind: input, shape index: {}]   ;;  %s1322_s9 = inlined_call_operand.vmem [shape: f32[32,128], index: 9, kind: input, shape index: {}]   ;;  %s1323_s10 = inlined_call_operand.vmem [shape: f32[1,128], index: 10, kind: input, shape index: {}]   ;;  %s1324_s11 = inlined_call_operand.vmem [shape: f32[128,32], index: 11, kind: input, shape index: {}]   ;;  %s1325_s12 = inlined_call_operand.vmem [shape: f32[1,32], index: 12, kind: input, shape index: {}]   ;;  %s1326_s13 = inlined_call_operand.vmem [shape: f32[32,8], index: 13, kind: input, shape index: {}]   ;;  %s1327_s14 = inlined_call_operand.vmem [shape: f32[2,32], index: 14, kind: input, shape index: {}]   ;;  %s1328_s15 = inlined_call_operand.vmem [shape: f32[2,4], index: 15, kind: input, shape index: {}]   ;;  %s1329_s16 = inlined_call_operand.hbm [shape: f32[2,128], index: 16, kind: output, shape index: {}]  }
   0x1   :  { %1330 = sst [smem:[#allocation6_spill]] %s1313_s0  ;;  %v21_v0 = vstv %s1319_s6 }
   0x2   :  { %22 = vst [vmem:[#allocation2] sm:$0x1] %v21_v0 }
   0x3   :  { %v57_v1 = vld [vmem:[%s1314_s1] sm:$0xff]  ;;  %v58_v2 = vld [vmem:[%s1314_s1 + $0x8] sm:$0xff]  ;;  %v59_v3 = vld [vmem:[%s1314_s1 + $0x10] sm:$0xff]  ;;  %v1007_v4 = vmov 0.0|0.0   ;;  %vm1008_vm0 = vmmov 0   ;;  %v1009_v7 = vmov 0.0  }
   0x4   :  { %901 = vmatprep.subr.bf16.mxu1 %v1007_v4  ;;  %v902_v5 = vpack.c.bf16 %v58_v2, %v57_v1  ;;  %v60_v6 = vld [vmem:[%s1314_s1 + $0x18] sm:$0xff]  ;;  %808 = vmatprep.mubr.msk.f32.mxu1 %vm1008_vm0, %v1009_v7  ;;  %694 = vst [vmem:[#allocation3] sm:$0x3] %v1009_v7  ;;  %v61_v9 = vld [vmem:[%s1314_s1 + $0x20] sm:$0xff]  ;;  %v62_v11 = vld [vmem:[%s1314_s1 + $0x28] sm:$0xff] }
   0x5   :  { %925 = vmatprep.subr.bf16.mxu0 %v1007_v4  ;;  %841 = vmatprep.mubr.msk.f32.mxu0 %vm1008_vm0, %v1009_v7  ;;  %v905_v8 = vpack.c.bf16 %v60_v6, %v59_v3  ;;  %v317_v10 = vld [vmem:[%s1320_s7] sm:$0xff]  ;;  %v318_v12 = vld [vmem:[%s1320_s7 + $0x8] sm:$0xff] }
   0x6   :  { %903 = vmatpush3.bf16.msra.mxu1 %v902_v5 }
   0x7   :  { %904 = vmatprep.subr.bf16.mxu1 %v1007_v4 }
   0x8   :  { %23 = vsyncpa [#allocation4], 0  ;;  %v926_v13 = vpack.c.bf16 %v318_v12, %v317_v10  ;;  %v908_v14 = vpack.c.bf16 %v62_v11, %v61_v9  ;;  %v63_v15 = vld [vmem:[%s1314_s1 + $0x30] sm:$0xff]  ;;  %v64_v16 = vld [vmem:[%s1314_s1 + $0x38] sm:$0xff]  ;;  %s1331_s17 = sld [smem:[#allocation6_spill]]  ;;  %vm72_vm1 = vcmask 523264  }
   0x9   :  { %v911_v17 = vpack.c.bf16 %v64_v16, %v63_v15  ;;  %v147_v18 = vld [vmem:[%s1316_s3] sm:$0xff]  ;;  %v148_v19 = vld [vmem:[%s1316_s3 + $0x8] sm:$0xff]  ;;  %v149_v22 = vld [vmem:[%s1316_s3 + $0x10] sm:$0xff]  ;;  %vm158_vm2 = vcmask 261120   ;;  %vm695_vm3 = vcmask 1024   ;;  %vm701_vm8 = vcmask 33800  }
   0xa   :  { %906 = vmatpush3.bf16.msra.mxu1 %v905_v8  ;;  %927 = vmatpush3.bf16.msra.mxu0 %v926_v13  ;;  %v914_v21 = vpack.c.bf16 %v148_v19, %v147_v18  ;;  %v150_v23 = vld [vmem:[%s1316_s3 + $0x18] sm:$0xff]  ;;  %v319_v24 = vld [vmem:[%s1320_s7 + $0x10] sm:$0xff]  ;;  %v729_v28 = vld [vmem:[%s1315_s2] ss:$0 sm:$0xff]  ;;  %vm707_vm9 = vcmask 66600   ;;  %vm713_vm10 = vcmask 99400  }
   0xb   :  { %907 = vmatprep.subr.bf16.mxu1 %v1007_v4  ;;  %928 = vmatprep.subr.bf16.mxu0 %v1007_v4  ;;  %v917_v25 = vpack.c.bf16 %v150_v23, %v149_v22  ;;  %v320_v26 = vld [vmem:[%s1320_s7 + $0x18] sm:$0xff]  ;;  %v233_v29 = vld [vmem:[%s1318_s5] sm:$0xff]  ;;  %v234_v30 = vld [vmem:[%s1318_s5 + $0x8] sm:$0xff] }
   0xc   :  { %v929_v27 = vpack.c.bf16 %v320_v26, %v319_v24  ;;  %v920_v34 = vpack.c.bf16 %v234_v30, %v233_v29  ;;  %v235_v36 = vld [vmem:[%s1318_s5 + $0x10] sm:$0xff]  ;;  %v236_v37 = vld [vmem:[%s1318_s5 + $0x18] sm:$0xff]  ;;  %v484_v39 = vld [vmem:[%s1324_s11] sm:$0xff] }
   0xd   :  { %v923_v38 = vpack.c.bf16 %v236_v37, %v235_v36  ;;  %v485_v40 = vld [vmem:[%s1324_s11 + $0x8] sm:$0xff]  ;;  %v486_v41 = vld [vmem:[%s1324_s11 + $0x10] sm:$0xff]  ;;  %v487_v43 = vld [vmem:[%s1324_s11 + $0x18] sm:$0xff] }
   0xe   :  { %909 = vmatpush3.bf16.msra.mxu1 %v908_v14  ;;  %v56_v20 = vld [vmem:[%s1331_s17] sm:$0x3]  ;;  %930 = vmatpush3.bf16.msra.mxu0 %v929_v27  ;;  %v938_v42 = vpack.c.bf16 %v485_v40, %v484_v39  ;;  %v941_v44 = vpack.c.bf16 %v487_v43, %v486_v41  ;;  %v489_v46 = vld [vmem:[%s1324_s11 + $0x28] sm:$0xff]  ;;  %v490_v48 = vld [vmem:[%s1324_s11 + $0x30] sm:$0xff] }
   0xf   :  { %910 = vmatprep.subr.bf16.mxu1 %v1007_v4  ;;  %937 = vmatprep.subr.bf16.mxu0 %v1007_v4  ;;  %v488_v45 = vld [vmem:[%s1324_s11 + $0x20] sm:$0xff]  ;;  %v491_v49 = vld [vmem:[%s1324_s11 + $0x38] sm:$0xff]  ;;  %v493_v52 = vld [vmem:[%s1324_s11 + $0x48] sm:$0xff] }
  0x10   :  { %v944_v47 = vpack.c.bf16 %v489_v46, %v488_v45  ;;  %v947_v50 = vpack.c.bf16 %v491_v49, %v490_v48  ;;  %v492_v51 = vld [vmem:[%s1324_s11 + $0x40] sm:$0xff]  ;;  %v400_v56 = vld [vmem:[%s1322_s9 + $0x8] sm:$0xff]  ;;  %v401_v0 = vld [vmem:[%s1322_s9 + $0x10] sm:$0xff] }
  0x11   :  { %v950_v53 = vpack.c.bf16 %v493_v52, %v492_v51  ;;  %v731_v54 = vld [vmem:[%s1317_s4] ss:$0 sm:$0xff]  ;;  %v402_v1 = vld [vmem:[%s1322_s9 + $0x18] sm:$0xff]  ;;  %v494_v8 = vld [vmem:[%s1324_s11 + $0x50] sm:$0xff] }
  0x12   :  { %912 = vmatpush3.bf16.msra.mxu1 %v911_v17  ;;  %v399_v55 = vld [vmem:[%s1322_s9] sm:$0xff]  ;;  %v935_v3 = vpack.c.bf16 %v402_v1, %v401_v0  ;;  %v495_v9 = vld [vmem:[%s1324_s11 + $0x58] sm:$0xff]  ;;  %v497_v12 = vld [vmem:[%s1324_s11 + $0x68] sm:$0xff] }
  0x13   :  { %913 = vmatprep.subr.bf16.mxu1 %v1007_v4  ;;  %v932_v62 = vpack.c.bf16 %v400_v56, %v399_v55  ;;  %v735_v2 = vld [vmem:[%s1321_s8] ss:$0 sm:$0xff]  ;;  %v953_v10 = vpack.c.bf16 %v495_v9, %v494_v8  ;;  %v499_v14 = vld [vmem:[%s1324_s11 + $0x78] sm:$0xff]  ;;  %v580_v17 = vld [vmem:[%s1326_s13 + $0x8] sm:$0xff] }
  0x14   :  { %v496_v11 = vld [vmem:[%s1324_s11 + $0x60] sm:$0xff] }
  0x15   :  { %809 = vmatmul.mubr.msk.f32.vlgmr.msra.gmra.mrb[0].mxu1 %vm72_vm1, %v56_v20  ;;  %v956_v13 = vpack.c.bf16 %v497_v12, %v496_v11  ;;  %v579_v16 = vld [vmem:[%s1326_s13] sm:$0xff] }
  0x16   :  { %915 = vmatpush3.bf16.msra.mxu1 %v914_v21  ;;  %819 = vmatprep.mubr.msk.f32.mxu1 %vm1008_vm0, %v1009_v7  ;;  %v962_v18 = vpack.c.bf16 %v580_v17, %v579_v16  ;;  %v733_v19 = vld [vmem:[#allocation2] ss:$0 sm:$0xff] }
  0x17   :  { %916 = vmatprep.subr.bf16.mxu1 %v1007_v4  ;;  %v737_v23 = vld [vmem:[%s1323_s10] ss:$0 sm:$0xff]  ;;  %s1010_s10 = smov 4  }
  0x18   :  { %v683_v30 = vld [vmem:[%s1328_s15] sm:$0x3]  ;;  %s1014_s15 = smov [#allocation3]  }
  0x19   :  { %685 = vrot.lane.b32.xlu0 %v683_v30, %s1010_s10  ;;  %s721_s25 = sshll.u32 %s1014_s15, 4  ;;  %s722_s25 = int_to_ptr.vmem [resolvable:$true] %s721_s25 }
  0x1a   :  { %918 = vmatpush3.bf16.msra.mxu1 %v917_v25  ;;  %s983_s26 = scalar_lea.vmem %s722_s25, 32  ;;  %p988_p1 = scmp.lt.s32.totalorder %s722_s25, %s722_s25 }
  0x1b   :  { %919 = vmatprep.subr.bf16.mxu1 %v1007_v4  ;;  %p984_p0 = scmp.ne.s32.totalorder %s722_s25, %s983_s26  ;;  %p989_p2 = scmp.lt.s32.totalorder %s983_s26, %s983_s26 }
  0x1d   :  { %p990_p3 = por %p989_p2, %p988_p1 }
  0x1f   :  { %p991_p4 = pnand %p990_p3, %p984_p0 }
  0xe8   :  { %v142_v31 = vpop.f32.mrb[0].mxu1 }
  0xe9   :  { %v143_v32 = vadd.f32 %v729_v28, %v142_v31  ;;  %v810_v33 = vpop.f32.mrb[1].mxu1  ;;  %v581_v28 = vld [vmem:[%s1326_s13 + $0x10] sm:$0xff]  ;;  %v739_v31 = vld [vmem:[%s1325_s12] ss:$0 sm:$0xff]  ;;  %s1011_s12 = smov 124  }
  0xea   :  { %v577_v33 = vld [vmem:[%s1327_s14] sm:$0x3]  ;;  %s1013_s14 = smov 1  }
  0xeb   :  { %v146_v35 = vmax.f32 %v143_v32, 0.0 }
  0xed   :  { %820 = vmatmul.mubr.msk.f32.vlgmr.msra.gmra.mrb[2].mxu1 %vm158_vm2, %v146_v35  ;;  %842 = vmatmul.mubr.msk.f32.vlgmr.msra.gmra.mrb[0].mxu0 %vm158_vm2, %v146_v35 }
  0xee   :  { %921 = vmatpush3.bf16.msra.mxu1 %v920_v34  ;;  %830 = vmatprep.mubr.msk.f32.mxu1 %vm1008_vm0, %v1009_v7 }
  0xef   :  { %922 = vmatprep.subr.bf16.mxu1 %v1007_v4  ;;  %887 = vmatprep.mubr.msk.f32.mxu0 %vm1008_vm0, %v1009_v7 }
  0xf0   :  { %939 = vmatpush3.bf16.msra.mxu0 %v938_v42 }
  0xf1   :  { %940 = vmatprep.subr.bf16.mxu0 %v1007_v4 }
  0xf2   :  { %924 = vmatpush3.bf16.msra.mxu1 %v923_v38 }
  0xf3   :  { %931 = vmatprep.subr.bf16.mxu1 %v1007_v4 }
  0xf4   :  { %942 = vmatpush3.bf16.msra.mxu0 %v941_v44 }
  0xf5   :  { %943 = vmatprep.subr.bf16.mxu0 %v1007_v4 }
  0xf8   :  { %945 = vmatpush3.bf16.msra.mxu0 %v944_v47 }
  0xf9   :  { %946 = vmatprep.subr.bf16.mxu0 %v1007_v4 }
  0xfc   :  { %948 = vmatpush3.bf16.msra.mxu0 %v947_v50 }
  0xfd   :  { %949 = vmatprep.subr.bf16.mxu0 %v1007_v4 }
 0x100   :  { %951 = vmatpush3.bf16.msra.mxu0 %v950_v53 }
 0x101   :  { %952 = vmatprep.subr.bf16.mxu0 %v1007_v4 }
 0x104   :  { %954 = vmatpush3.bf16.msra.mxu0 %v953_v10 }
 0x105   :  { %955 = vmatprep.subr.bf16.mxu0 %v1007_v4 }
 0x108   :  { %957 = vmatpush3.bf16.msra.mxu0 %v956_v13 }
 0x109   :  { %958 = vmatprep.subr.bf16.mxu0 %v1007_v4 }
 0x1c0   :  { %v228_v57 = vpop.f32.mrb[2].mxu1  ;;  %v394_v58 = vpop.f32.mrb[0].mxu0 }
 0x1c1   :  { %v229_v59 = vadd.f32 %v731_v54, %v228_v57  ;;  %v821_v60 = vpop.f32.mrb[3].mxu1  ;;  %v843_v61 = vpop.f32.mrb[1].mxu0  ;;  %v395_v5 = vadd.f32 %v735_v2, %v394_v58 }
 0x1c2   :  { %v686_v58 = vpop.permute.xlu0 %685 }
 0x1c3   :  { %v232_v63 = vmax.f32 %v229_v59, 0.0  ;;  %v398_v6 = vmax.f32 %v395_v5, 0.0 }
 0x1c5   :  { %831 = vmatmul.mubr.msk.f32.vlgmr.msra.gmra.mrb[4].mxu1 %vm158_vm2, %v232_v63 }
 0x1c6   :  { %933 = vmatpush3.bf16.msra.mxu1 %v932_v62  ;;  %852 = vmatprep.mubr.msk.f32.mxu1 %vm1008_vm0, %v1009_v7 }
 0x1c7   :  { %934 = vmatprep.subr.bf16.mxu1 %v1007_v4 }
 0x1ca   :  { %936 = vmatpush3.bf16.msra.mxu1 %v935_v3 }
 0x1cb   :  { %961 = vmatprep.subr.bf16.mxu1 %v1007_v4 }
 0x1cd   :  { %853 = vmatmul.mubr.msk.f32.vlgmr.msra.gmra.mrb[6].mxu1 %vm158_vm2, %v398_v6 }
 0x1ce   :  { %898 = vmatprep.mubr.msk.f32.mxu1 %vm1008_vm0, %v1009_v7  ;;  %v498_v7 = vld [vmem:[%s1324_s11 + $0x70] sm:$0xff]  ;;  %963 = vmatpush3.bf16.msra.mxu1 %v962_v18 }
 0x1cf   :  { %v959_v15 = vpack.c.bf16 %v499_v14, %v498_v7  ;;  %964 = vmatprep.subr.bf16.mxu1 %v1007_v4  ;;  %v582_v4 = vld [vmem:[%s1326_s13 + $0x18] sm:$0xff]  ;;  %s1012_s13 = smov 5  }
 0x1d0   :  { %v965_v29 = vpack.c.bf16 %v582_v4, %v581_v28 }
 0x1d1   :  { %960 = vmatpush3.bf16.msra.mxu0 %v959_v15 }
 0x1d2   :  { %966 = vmatpush3.bf16.msra.mxu1 %v965_v29 }
 0x298   :  { %v313_v20 = vpop.f32.mrb[4].mxu1 }
 0x299   :  { %v314_v21 = vadd.f32 %v733_v19, %v313_v20  ;;  %v832_v22 = vpop.f32.mrb[5].mxu1 }
 0x29b   :  { %696 = vst.msk [vmem:[#allocation3] sm:$0x3] %vm695_vm3, %v314_v21 }
 0x2a0   :  { %v479_v24 = vpop.f32.mrb[6].mxu1 }
 0x2a1   :  { %v480_v25 = vadd.f32 %v737_v23, %v479_v24  ;;  %v854_v26 = vpop.f32.mrb[7].mxu1 }
 0x2a3   :  { %v483_v27 = vmax.f32 %v480_v25, 0.0 }
 0x2a5   :  { %888 = vmatmul.mubr.f32.vlgmr.msra.gmra.mrb[2].mxu0 %v483_v27 }
 0x378   :  { %v573_v32 = vpop.f32.mrb[2].mxu0 }
 0x379   :  { %v574_v34 = vadd.f32 %v739_v31, %v573_v32  ;;  %v889_v35 = vpop.f32.mrb[3].mxu0 }
 0x37b   :  { %v578_v36 = vmul.f32 %v577_v33, %v574_v34 }
 0x37d   :  { %899 = vmatmul.mubr.msk.f32.vlgmr.msra.gmra.mrb[8].mxu1 %vm158_vm2, %v578_v36 }
 0x450   :  { %v652_v37 = vpop.f32.mrb[8].mxu1 }
 0x451   :  { %v660_v38 = vand.u32 2147483647, %v652_v37  ;;  %v900_v39 = vpop.f32.mrb[9].mxu1  ;;  %v657_v50 = vmax.f32 %v652_v37, 0.0  ;;  %vm658_vm5 = vcmp.ne.f32.partialorder %v652_v37, %v652_v37 }
 0x453   :  { %v661_v40 = vsub.f32 0.0, %v660_v38 }
 0x455   :  { %v662_v41 = vmul.f32 1.442695, %v661_v40 }
 0x457   :  { %975 = vpow2.f32 %v662_v41 }
 0x461   :  { %v976_v42 = vpop.eup %975 }
 0x462   :  { %v664_v43 = vadd.f32 1.0, %v976_v42  ;;  %v667_v44 = vmul.f32 -0.5, %v976_v42  ;;  %v670_v46 = vand.u32 2147483647, %v976_v42 }
 0x464   :  { %977 = vlog2.f32 %v664_v43  ;;  %v668_v45 = vadd.f32 1.0, %v667_v44  ;;  %vm671_vm4 = vcmp.lt.f32.partialorder %v670_v46, 0.0004427343 }
 0x466   :  { %v669_v49 = vmul.f32 %v976_v42, %v668_v45 }
 0x46e   :  { %v978_v47 = vpop.eup %977 }
 0x46f   :  { %v666_v48 = vmul.f32 0.6931472, %v978_v47 }
 0x471   :  { %v672_v51 = vsel %vm671_vm4, %v669_v49, %v666_v48 }
 0x472   :  { %v673_v52 = vadd.f32 %v672_v51, %v657_v50 }
 0x474   :  { %v674_v53 = vsel %vm658_vm5, %v652_v37, %v673_v52 }
 0x475   :  { %979 = vrsqrt.f32 %v674_v53  ;;  %vm677_vm6 = vcmp.eq.f32.partialorder %v674_v53, inf  ;;  %v680_v56 = vand.u32 2147483648, %v674_v53  ;;  %vm679_vm7 = vcmp.eq.f32.partialorder %v674_v53, 0.0 }
 0x476   :  { %981 = vtanh.f32 %v652_v37 }
 0x47f   :  { %v980_v54 = vpop.eup %979 }
 0x480   :  { %v676_v55 = vmul.f32 %v980_v54, %v674_v53  ;;  %v982_v62 = vpop.eup %981 }
 0x482   :  { %v678_v57 = vsel %vm677_vm6, %v674_v53, %v676_v55 }
 0x483   :  { %v681_v59 = vsel %vm679_vm7, %v680_v56, %v678_v57 }
 0x484   :  { %v682_v60 = vmax.f32 %v681_v59, 0.001 }
 0x486   :  { %v688_v61 = vmul.f32 %v686_v58, %v682_v60 }
 0x488   :  { %690 = vrot.lane.b32.xlu0 %v688_v61, %s1011_s12 }
 0x48c   :  { %710 = vrot.lane.b32.xlu0 %v674_v53, %s1012_s13 }
 0x4fa   :  { %v691_v63 = vpop.permute.xlu0 %690 }
 0x4fb   :  { %v693_v0 = vadd.f32 %v982_v62, %v691_v63 }
 0x4fd   :  { %698 = vrot.lane.b32.xlu1 %v693_v0, %s1013_s14 }
 0x4fe   :  { %v711_v3 = vpop.permute.xlu0 %710 }
 0x501   :  { %704 = vrot.lane.b32.xlu1 %v982_v62, %s1012_s13 }
 0x56f   :  { %v699_v1 = vpop.permute.xlu1 %698 }
 0x570   :  { %702 = vst.msk [vmem:[#allocation3] sm:$0x3] %vm701_vm8, %v699_v1 }
 0x573   :  { %v705_v2 = vpop.permute.xlu1 %704 }
 0x574   :  { %708 = vst.msk [vmem:[#allocation3] sm:$0x3] %vm707_vm9, %v705_v2 }
 0x575   :  { %714 = vst.msk [vmem:[#allocation3] sm:$0x3] %vm713_vm10, %v711_v3 }
 0x576   :  { %994 = shalt.err (!%p991_p4)
}
 0x577   :  { %s995_s28 = scalar_lea.hbm %s1329_s16, 32 }
 0x578   :  { %p996_p5 = scmp.ne.s32.totalorder %s1329_s16, %s995_s28  ;;  %p999_p6 = scmp.lt.u32.totalorder %s995_s28, %s1329_s16 }
 0x57a   :  { %p1001_p7 = pnand %p999_p6, %p996_p5 }
 0x57c   :  { %1004 = shalt.err (!%p1001_p7)
}
 0x57d   :  { %724 = dma.vmem_to_hbm [thread:$0]  %s722_s25, 32, %s1329_s16, [#allocation4]  }
 0x57e   :  { %1005 = dma.done.wait [#allocation4], 32  }
 0x57f   :  { %1006 = vsyncadd [#allocation4], 4294967264 }
 0x580   :  { %728 = vsyncpa [#allocation4], 1 }

</bundles_post_ra>
